<compile_context>
chip_gen: v7x
topology: tpu7x:2x2x1
jax: 0.10.0
libtpu: 0.0.40
codegen_flags: <defaults>
</compile_context>

<pallas_src>
import jax
import jax.numpy as jnp
from jax import lax
from jax.experimental import pallas as pl
from jax.experimental.pallas import tpu as pltpu

TM = 512                        # row tile over the N*OH*OW axis
LANE = 128                      # TPU lane width; OC and K padded to multiples of this
VMEM_LIMIT = 32 * 1024 * 1024   # raise scoped VMEM (v5e default is only 16 MiB)


def _round_up(x, m):
    return ((x + m - 1) // m) * m


# ---------------- Pallas kernels ----------------

def _conv_stats_kernel(a_ref, b_ref, o_ref, stats_ref, acc_ref):
    """im2col rows @ conv weights (bf16 -> f32 acc) with fused BN-stats epilogue."""
    @pl.when(pl.program_id(0) == 0)
    def _():
        acc_ref[...] = jnp.zeros_like(acc_ref)

    y = jnp.dot(a_ref[...], b_ref[...], preferred_element_type=jnp.float32)
    o_ref[...] = y

    # Per-channel sum and sum-of-squares accumulated across row tiles. Padded rows
    # are all zero and contribute nothing; the true row count M is divided out later.
    acc_ref[...] += jnp.stack([jnp.sum(y, axis=0), jnp.sum(y * y, axis=0)], axis=0)

    @pl.when(pl.program_id(0) == pl.num_programs(0) - 1)
    def _():
        stats_ref[...] = acc_ref[...]


def _bn_relu_kernel(y_ref, scale_ref, shift_ref, o_ref):
    """Fused BatchNorm affine + ReLU (elementwise, f32)."""
    o_ref[...] = jnp.maximum(y_ref[...] * scale_ref[...] + shift_ref[...], 0.0)


# ---------------- glue (plain JAX) ----------------

def _im2col(x, k, stride, pad):
    N, C, H, W = x.shape
    xp = jnp.pad(x, ((0, 0), (0, 0), (pad, pad), (pad, pad)))
    OH = (H + 2 * pad - k) // stride + 1
    OW = (W + 2 * pad - k) // stride + 1
    taps = []
    for ki in range(k):
        for kj in range(k):
            taps.append(xp[:, :, ki:ki + stride * OH:stride, kj:kj + stride * OW:stride])
    col = jnp.stack(taps, axis=2)                        # (N, C, k*k, OH, OW)
    col = col.transpose(0, 3, 4, 1, 2).reshape(N * OH * OW, C * k * k)
    return col, OH, OW


def conv_bn_act_forward(x, weight, gamma, beta, *, kernel_size, stride=1, eps=1e-5):
    """x: (N, C, H, W) f32; weight: (OC, C, k, k); gamma/beta: (OC,). Returns NCHW f32."""
    N, C, H, W = x.shape
    OC = weight.shape[0]
    pad = (kernel_size - 1) // 2
    K = C * kernel_size * kernel_size

    # TODO(synk): the im2col matrix is still materialized by XLA; a K-chunked reduction
    # grid reading shifted windows of the padded input directly would remove this pass.
    col, OH, OW = _im2col(x.astype(jnp.float32), kernel_size, stride, pad)
    M = N * OH * OW

    Mp = _round_up(M, TM)
    Kp = _round_up(K, LANE)
    OCp = _round_up(OC, LANE)

    # bf16 matmul operands (f32 accumulation inside the kernel); zero padding is inert.
    col_p = jnp.pad(col, ((0, Mp - M), (0, Kp - K))).astype(jnp.bfloat16)
    w2 = jnp.pad(weight.reshape(OC, K).T.astype(jnp.float32),
                 ((0, Kp - K), (0, OCp - OC))).astype(jnp.bfloat16)
    gamma_p = jnp.pad(gamma.astype(jnp.float32), (0, OCp - OC))
    beta_p = jnp.pad(beta.astype(jnp.float32), (0, OCp - OC))

    grid = (Mp // TM,)

    # --- conv as im2col matmul with fused BN-statistics epilogue ---
    conv_out, sums = pl.pallas_call(
        _conv_stats_kernel,
        out_shape=(jax.ShapeDtypeStruct((Mp, OCp), jnp.float32),
                   jax.ShapeDtypeStruct((2, OCp), jnp.float32)),
        grid_spec=pltpu.PrefetchScalarGridSpec(
            num_scalar_prefetch=0, grid=grid,
            in_specs=[pl.BlockSpec((TM, Kp), lambda i: (i, 0)),
                      pl.BlockSpec((Kp, OCp), lambda i: (0, 0))],
            out_specs=[pl.BlockSpec((TM, OCp), lambda i: (i, 0)),
                       pl.BlockSpec((2, OCp), lambda i: (0, 0))],
            scratch_shapes=[pltpu.VMEM((2, OCp), jnp.float32)]),
        compiler_params=pltpu.CompilerParams(
            # "arbitrary": this grid axis carries the stats accumulator (a single
            # shared accumulator would race under "parallel"; per-core partials
            # would be the further optimization for v7x's 2 TensorCores).
            dimension_semantics=("arbitrary",),
            vmem_limit_bytes=VMEM_LIMIT),
    )(col_p, w2)

    # PyTorch train-mode BatchNorm: biased variance over (N, H, W) per channel.
    mean = sums[0] / M
    var = jnp.maximum(sums[1] / M - mean * mean, 0.0)    # clamp cancellation noise
    scale = (gamma_p / jnp.sqrt(var + eps)).reshape(1, OCp)
    shift = (beta_p - mean * scale[0]).reshape(1, OCp)

    # --- fused BN affine + ReLU ---
    out = pl.pallas_call(
        _bn_relu_kernel,
        out_shape=jax.ShapeDtypeStruct((Mp, OCp), jnp.float32),
        grid_spec=pltpu.PrefetchScalarGridSpec(
            num_scalar_prefetch=0, grid=grid,
            in_specs=[pl.BlockSpec((TM, OCp), lambda i: (i, 0)),
                      pl.BlockSpec((1, OCp), lambda i: (0, 0)),
                      pl.BlockSpec((1, OCp), lambda i: (0, 0))],
            out_specs=pl.BlockSpec((TM, OCp), lambda i: (i, 0))),
        compiler_params=pltpu.CompilerParams(
            dimension_semantics=("parallel",),
            vmem_limit_bytes=VMEM_LIMIT),
    )(conv_out, scale, shift)

    # Slice off row/channel padding; back to NCHW (module contract).
    # TODO(synk): the NHWC->NCHW transpose is an extra XLA pass; could be folded into
    # the BN/ReLU kernel with a per-tile XLU transpose and an NCHW out_spec.
    return out[:M, :OC].reshape(N, OH, OW, OC).transpose(0, 3, 1, 2)


if __name__ == "__main__":
    key = jax.random.PRNGKey(0)
    k1, k2 = jax.random.split(key)

    N, C, H, W = 2, 4, 16, 16
    OC, KS, STRIDE = 8, 3, 1

    x = jax.random.normal(k1, (N, C, H, W), jnp.float32)
    # Conv2d weight (bias=False since use_bn=True); BN gamma=1, beta=0 (PyTorch defaults).
    weight = jax.random.normal(k2, (OC, C, KS, KS), jnp.float32) * 0.1
    gamma = jnp.ones((OC,), jnp.float32)
    beta = jnp.zeros((OC,), jnp.float32)

    out = conv_bn_act_forward(x, weight, gamma, beta, kernel_size=KS, stride=STRIDE)
    out = jax.block_until_ready(out)

    # Plain-JAX reference (conv -> train-mode BN -> ReLU).
    pad = (KS - 1) // 2
    ref_conv = lax.conv_general_dilated(
        x, weight, (STRIDE, STRIDE), padding=[(pad, pad), (pad, pad)],
        dimension_numbers=("NCHW", "OIHW", "NCHW"))
    mu = jnp.mean(ref_conv, axis=(0, 2, 3), keepdims=True)
    var = jnp.mean((ref_conv - mu) ** 2, axis=(0, 2, 3), keepdims=True)
    ref = jnp.maximum(
        (ref_conv - mu) / jnp.sqrt(var + 1e-5) * gamma.reshape(1, -1, 1, 1)
        + beta.reshape(1, -1, 1, 1), 0.0)

    assert out.shape == (N, OC, H // STRIDE, W // STRIDE)
    # Tolerance accounts for bf16 MXU operands (BN math stays in f32).
    assert jnp.allclose(out, ref, atol=3e-2, rtol=3e-2), float(jnp.max(jnp.abs(out - ref)))
    print("KERNEL_OK")
</pallas_src>

<mosaic_0001>
module attributes {stable_mosaic.version = 11 : i64} {
  func.func @_conv_stats_kernel(%arg0: i32, %arg1: memref<512x128xbf16, #tpu.memory_space<vmem>>, %arg2: memref<128x128xbf16, #tpu.memory_space<vmem>>, %arg3: memref<512x128xf32, #tpu.memory_space<vmem>>, %arg4: memref<2x128xf32, #tpu.memory_space<vmem>>, %arg5: memref<2x128xf32, #tpu.memory_space<vmem>>) attributes {dimension_semantics = [#tpu.dimension_semantics<arbitrary>], iteration_bounds = array<i64: 1>, scalar_prefetch = 0 : i64, scratch_operands = 1 : i64, tpu.core_type = #tpu.core_type<tc>, window_params = [{transform_indices = @transform_0, window_bounds = array<i64: 512, 128>}, {pipeline_mode = #tpu.pipeline_mode<synchronous>, transform_indices = @transform_1, window_bounds = array<i64: 128, 128>}, {transform_indices = @transform_2, window_bounds = array<i64: 512, 128>}, {pipeline_mode = #tpu.pipeline_mode<synchronous>, transform_indices = @transform_3, window_bounds = array<i64: 2, 128>}]} {
    %c0_i32 = arith.constant 0 : i32
    %0 = arith.cmpi eq, %arg0, %c0_i32 : i32
    %1 = arith.extui %0 : i1 to i32
    %c0_i32_0 = arith.constant 0 : i32
    %2 = arith.cmpi ne, %1, %c0_i32_0 : i32
    scf.if %2 {
      %cst_14 = arith.constant 0.000000e+00 : f32
      %19 = vector.broadcast %cst_14 : f32 to vector<2x128xf32>
      %c0_15 = arith.constant 0 : index
      %c0_16 = arith.constant 0 : index
      %20 = vector.load %arg5[%c0_15, %c0_16] : memref<2x128xf32, #tpu.memory_space<vmem>>, vector<2x128xf32>
      tpu.vector_store %arg5[%c0_15, %c0_16], %19 {strides = array<i32>} : memref<2x128xf32, #tpu.memory_space<vmem>>, vector<2x128xf32>,
    } else {
    }
    %c0 = arith.constant 0 : index
    %c0_1 = arith.constant 0 : index
    %3 = vector.load %arg1[%c0, %c0_1] : memref<512x128xbf16, #tpu.memory_space<vmem>>, vector<512x128xbf16>
    %c0_2 = arith.constant 0 : index
    %c0_3 = arith.constant 0 : index
    %4 = vector.load %arg2[%c0_2, %c0_3] : memref<128x128xbf16, #tpu.memory_space<vmem>>, vector<128x128xbf16>
    %cst = arith.constant dense<0.000000e+00> : vector<512x128xf32>
    %5 = tpu.matmul %3, %4, %cst {dimension_numbers = #tpu.dot_dimension_numbers<[1], [0], [0], [1], [0, 0, 1, 1], [], []>} : vector<512x128xbf16>, vector<128x128xbf16>, vector<512x128xf32> -> vector<512x128xf32>
    %c0_4 = arith.constant 0 : index
    %c0_5 = arith.constant 0 : index
    %6 = vector.load %arg3[%c0_4, %c0_5] : memref<512x128xf32, #tpu.memory_space<vmem>>, vector<512x128xf32>
    tpu.vector_store %arg3[%c0_4, %c0_5], %5 {strides = array<i32>} : memref<512x128xf32, #tpu.memory_space<vmem>>, vector<512x128xf32>,
    %c0_6 = arith.constant 0 : index
    %c0_7 = arith.constant 0 : index
    %7 = vector.load %arg5[%c0_6, %c0_7] : memref<2x128xf32, #tpu.memory_space<vmem>>, vector<2x128xf32>
    %cst_8 = arith.constant dense<0.000000e+00> : vector<128xf32>
    %8 = vector.multi_reduction <add>, %5, %cst_8 [0] : vector<512x128xf32> to vector<128xf32>
    %9 = arith.mulf %5, %5 : vector<512x128xf32>
    %cst_9 = arith.constant dense<0.000000e+00> : vector<128xf32>
    %10 = vector.multi_reduction <add>, %9, %cst_9 [0] : vector<512x128xf32> to vector<128xf32>
    %11 = vector.shape_cast %8 : vector<128xf32> to vector<1x128xf32>
    %12 = vector.shape_cast %10 : vector<128xf32> to vector<1x128xf32>
    %13 = tpu.concatenate %11, %12 in 0 : vector<1x128xf32>, vector<1x128xf32> -> vector<2x128xf32>
    %14 = arith.addf %7, %13 : vector<2x128xf32>
    %c0_10 = arith.constant 0 : index
    %c0_11 = arith.constant 0 : index
    %15 = vector.load %arg5[%c0_10, %c0_11] : memref<2x128xf32, #tpu.memory_space<vmem>>, vector<2x128xf32>
    tpu.vector_store %arg5[%c0_10, %c0_11], %14 {strides = array<i32>} : memref<2x128xf32, #tpu.memory_space<vmem>>, vector<2x128xf32>,
    %c0_i32_12 = arith.constant 0 : i32
    %16 = arith.cmpi eq, %arg0, %c0_i32_12 : i32
    %17 = arith.extui %16 : i1 to i32
    %c0_i32_13 = arith.constant 0 : i32
    %18 = arith.cmpi ne, %17, %c0_i32_13 : i32
    scf.if %18 {
      %c0_14 = arith.constant 0 : index
      %c0_15 = arith.constant 0 : index
      %19 = vector.load %arg5[%c0_14, %c0_15] : memref<2x128xf32, #tpu.memory_space<vmem>>, vector<2x128xf32>
      %c0_16 = arith.constant 0 : index
      %c0_17 = arith.constant 0 : index
      %20 = vector.load %arg4[%c0_16, %c0_17] : memref<2x128xf32, #tpu.memory_space<vmem>>, vector<2x128xf32>
      tpu.vector_store %arg4[%c0_16, %c0_17], %19 {strides = array<i32>} : memref<2x128xf32, #tpu.memory_space<vmem>>, vector<2x128xf32>,
    } else {
    }
    return
  }
  func.func @transform_0(%arg0: i32) -> (i32, i32) {
    %c0_i32 = arith.constant 0 : i32
    %c0_i32_0 = arith.constant 0 : i32
    return %arg0, %c0_i32 : i32, i32
  }
  func.func @transform_1(%arg0: i32) -> (i32, i32) {
    %c0_i32 = arith.constant 0 : i32
    %c0_i32_0 = arith.constant 0 : i32
    %c0_i32_1 = arith.constant 0 : i32
    return %c0_i32, %c0_i32_0 : i32, i32
  }
  func.func @transform_2(%arg0: i32) -> (i32, i32) {
    %c0_i32 = arith.constant 0 : i32
    %c0_i32_0 = arith.constant 0 : i32
    return %arg0, %c0_i32 : i32, i32
  }
  func.func @transform_3(%arg0: i32) -> (i32, i32) {
    %c0_i32 = arith.constant 0 : i32
    %c0_i32_0 = arith.constant 0 : i32
    %c0_i32_1 = arith.constant 0 : i32
    return %c0_i32, %c0_i32_0 : i32, i32
  }
}

</mosaic_0001>

<bundles_post_ra>
// kernel: tpu_custom_call.1
= control target key start
LH: loop header
LB: loop body
LE: loop exit
PB: predicated region body
PF: predicated region fallthrough
CT: control target
= control target key end

     0   :  { %9 = vsyncpa [#allocation4], 0  ;;  %s1556_s0 = inlined_call_operand.hbm [shape: bf16[512,128], index: 0, kind: input, shape index: {}]   ;;  %s1557_s1 = inlined_call_operand.hbm [shape: bf16[128,128], index: 1, kind: input, shape index: {}]   ;;  %s1558_s2 = inlined_call_operand.hbm [shape: f32[512,128], index: 2, kind: output, shape index: {0}]   ;;  %s1559_s3 = inlined_call_operand.hbm [shape: f32[2,128], index: 3, kind: output, shape index: {1}]  }
   0x1   :  { %10 = vsyncpa [#allocation7], 0 }
   0x2   :  { %11 = vsyncpa [#allocation5], 0 }
   0x3   :  { %12 = vsyncpa [#allocation10], 0  ;;  %s1287_s12 = smov [#allocation3]   ;;  %s1191_s16 = scalar_lea.hbm %s1556_s0, 4096 }
   0x4   :  { %s18_s13 = sshll.u32 %s1287_s12, 4  ;;  %p1192_p0 = scmp.ne.s32.totalorder %s1556_s0, %s1191_s16  ;;  %s19_s13 = int_to_ptr.vmem [resolvable:$true] %s18_s13 }
   0x5   :  { %p1195_p1 = scmp.lt.u32.totalorder %s1191_s16, %s1556_s0 }
   0x7   :  { %p1197_p2 = pnand %p1195_p1, %p1192_p0 }
   0x9   :  { %1200 = shalt.err (!%p1197_p2)
}
   0xa   :  { %s1201_s21 = scalar_lea.vmem %s19_s13, 4096  ;;  %p1206_p4 = scmp.lt.s32.totalorder %s19_s13, %s19_s13 }
   0xb   :  { %p1202_p3 = scmp.ne.s32.totalorder %s19_s13, %s1201_s21  ;;  %p1207_p5 = scmp.lt.s32.totalorder %s1201_s21, %s1201_s21 }
   0xd   :  { %p1208_p6 = por %p1207_p5, %p1206_p4 }
   0xf   :  { %p1209_p7 = pnand %p1208_p6, %p1202_p3 }
  0x11   :  { %1212 = shalt.err (!%p1209_p7)
}
  0x12   :  { %s1288_s22 = smov 64   ;;  %s1289_s23 = smov 4  }
  0x13   :  { %24 = dma.hbm_to_vmem [thread:$0]  %s1556_s0, 4096, %s19_s13, [#allocation4], %s1288_s22, %s1288_s22, %s1289_s23  }
  0x14   :  { %s1290_s26 = smov [#allocation6]   ;;  %s1213_s30 = scalar_lea.hbm %s1557_s1, 1024 }
  0x15   :  { %s30_s27 = sshll.u32 %s1290_s26, 4  ;;  %p1214_p8 = scmp.ne.s32.totalorder %s1557_s1, %s1213_s30  ;;  %s31_s27 = int_to_ptr.vmem [resolvable:$true] %s30_s27 }
  0x16   :  { %p1217_p9 = scmp.lt.u32.totalorder %s1213_s30, %s1557_s1 }
  0x18   :  { %p1219_p10 = pnand %p1217_p9, %p1214_p8 }
  0x1a   :  { %1222 = shalt.err (!%p1219_p10)
}
  0x1b   :  { %s1223_s8 = scalar_lea.vmem %s31_s27, 1024  ;;  %p1228_p12 = scmp.lt.s32.totalorder %s31_s27, %s31_s27 }
  0x1c   :  { %p1224_p11 = scmp.ne.s32.totalorder %s31_s27, %s1223_s8  ;;  %p1229_p13 = scmp.lt.s32.totalorder %s1223_s8, %s1223_s8 }
  0x1e   :  { %p1230_p0 = por %p1229_p13, %p1228_p12 }
  0x20   :  { %p1231_p1 = pnand %p1230_p0, %p1224_p11 }
  0x22   :  { %1234 = shalt.err (!%p1231_p1)
}
  0x23   :  { %36 = dma.hbm_to_vmem [thread:$0]  %s1557_s1, 1024, %s31_s27, [#allocation7], %s1288_s22, %s1288_s22, %s1289_s23  }
  0x24   :  { %1279 = dma.done.wait [#allocation4], 4096  }
  0x25   :  { %1280 = vsyncadd [#allocation4], 4294963200 }
  0x26   :  { %1281 = dma.done.wait [#allocation7], 1024  }
  0x27   :  { %1282 = vsyncadd [#allocation7], 4294966272  ;;  %v1151_v0 = vld [vmem:[#allocation6] sm:$0xff]   ;;  %v1152_v1 = vld [vmem:[#allocation6 + $0x8] sm:$0xff]   ;;  %v1291_v40 = vmov 0.0   ;;  %s1292_s1 = smov [#allocation8]  }
  0x28   :  { %1046 = vmatprep.subr.bf16.mxu0 %v1151_v0  ;;  %1126 = vmatprep.subr.bf16.mxu1 %v1151_v0  ;;  %v1153_v2 = vld [vmem:[#allocation6 + $0x10] sm:$0xff]   ;;  %v1154_v3 = vld [vmem:[#allocation6 + $0x18] sm:$0xff]   ;;  %v1159_v4 = vld [vmem:[#allocation3] sm:$0xff]   ;;  %48 = vst [vmem:[#allocation2] sm:$0x3] %v1291_v40  ;;  %s939_s10 = sshll.u32 %s1292_s1, 4  ;;  %s940_s10 = int_to_ptr.vmem [resolvable:$true] %s939_s10 }
  0x29   :  { %1047 = vmatpush3.bf16.msra.mxu0 %v1151_v0  ;;  %1134 = vmatpush3.bf16.msra.mxu1 %v1151_v0  ;;  %v1155_v5 = vld [vmem:[#allocation6 + $0x20] sm:$0xff]   ;;  %v1156_v6 = vld [vmem:[#allocation6 + $0x28] sm:$0xff]   ;;  %v1157_v7 = vld [vmem:[#allocation6 + $0x30] sm:$0xff]   ;;  %s1235_s11 = scalar_lea.vmem %s940_s10, 8192  ;;  %p1240_p3 = scmp.lt.s32.totalorder %s940_s10, %s940_s10 }
  0x2a   :  { %1048 = vmatprep.subr.bf16.mxu0 %v1152_v1  ;;  %1127 = vmatprep.subr.bf16.mxu1 %v1152_v1  ;;  %v1158_v8 = vld [vmem:[#allocation6 + $0x38] sm:$0xff]   ;;  %v1175_v9 = vld [vmem:[#allocation3 + $0x80] sm:$0xff]   ;;  %v1160_v10 = vld [vmem:[#allocation3 + $0x8] sm:$0xff]   ;;  %p1236_p2 = scmp.ne.s32.totalorder %s940_s10, %s1235_s11  ;;  %p1241_p4 = scmp.lt.s32.totalorder %s1235_s11, %s1235_s11 }
  0x2b   :  { %1062 = vmatprep.mubr.bf16.mxu0 %v1159_v4  ;;  %1094 = vmatprep.mubr.bf16.mxu1 %v1175_v9  ;;  %v1161_v11 = vld [vmem:[#allocation3 + $0x10] sm:$0xff]   ;;  %v1176_v12 = vld [vmem:[#allocation3 + $0x88] sm:$0xff]   ;;  %v1162_v14 = vld [vmem:[#allocation3 + $0x18] sm:$0xff]  }
  0x2c   :  { %v1177_v13 = vld [vmem:[#allocation3 + $0x90] sm:$0xff]   ;;  %v1163_v15 = vld [vmem:[#allocation3 + $0x20] sm:$0xff]   ;;  %v1178_v16 = vld [vmem:[#allocation3 + $0x98] sm:$0xff]   ;;  %p1242_p5 = por %p1241_p4, %p1240_p3 }
  0x2d   :  { %1049 = vmatpush3.bf16.msra.mxu0 %v1152_v1  ;;  %1135 = vmatpush3.bf16.msra.mxu1 %v1152_v1  ;;  %v1179_v17 = vld [vmem:[#allocation3 + $0xa0] sm:$0xff]   ;;  %v1164_v18 = vld [vmem:[#allocation3 + $0x28] sm:$0xff]   ;;  %v1165_v20 = vld [vmem:[#allocation3 + $0x30] sm:$0xff]  }
  0x2e   :  { %1050 = vmatprep.subr.bf16.mxu0 %v1153_v2  ;;  %1128 = vmatprep.subr.bf16.mxu1 %v1153_v2  ;;  %v1180_v19 = vld [vmem:[#allocation3 + $0xa8] sm:$0xff]   ;;  %v1181_v21 = vld [vmem:[#allocation3 + $0xb0] sm:$0xff]   ;;  %v1166_v22 = vld [vmem:[#allocation3 + $0x38] sm:$0xff]   ;;  %p1243_p6 = pnand %p1242_p5, %p1236_p2 }
  0x2f   :  { %v1182_v23 = vld [vmem:[#allocation3 + $0xb8] sm:$0xff]   ;;  %v1167_v24 = vld [vmem:[#allocation3 + $0x40] sm:$0xff]   ;;  %v1168_v26 = vld [vmem:[#allocation3 + $0x48] sm:$0xff]  }
  0x30   :  { %v1183_v25 = vld [vmem:[#allocation3 + $0xc0] sm:$0xff]   ;;  %v1184_v27 = vld [vmem:[#allocation3 + $0xc8] sm:$0xff]   ;;  %v1169_v28 = vld [vmem:[#allocation3 + $0x50] sm:$0xff]  }
  0x31   :  { %1051 = vmatpush3.bf16.msra.mxu0 %v1153_v2  ;;  %1136 = vmatpush3.bf16.msra.mxu1 %v1153_v2  ;;  %v1185_v29 = vld [vmem:[#allocation3 + $0xd0] sm:$0xff]   ;;  %v1170_v30 = vld [vmem:[#allocation3 + $0x58] sm:$0xff]   ;;  %v1171_v32 = vld [vmem:[#allocation3 + $0x60] sm:$0xff]  }
  0x32   :  { %1052 = vmatprep.subr.bf16.mxu0 %v1154_v3  ;;  %1129 = vmatprep.subr.bf16.mxu1 %v1154_v3  ;;  %v1186_v31 = vld [vmem:[#allocation3 + $0xd8] sm:$0xff]   ;;  %v1187_v33 = vld [vmem:[#allocation3 + $0xe0] sm:$0xff]   ;;  %v1172_v34 = vld [vmem:[#allocation3 + $0x68] sm:$0xff]  }
  0x33   :  { %v1188_v35 = vld [vmem:[#allocation3 + $0xe8] sm:$0xff]   ;;  %v1173_v36 = vld [vmem:[#allocation3 + $0x70] sm:$0xff]   ;;  %v1174_v38 = vld [vmem:[#allocation3 + $0x78] sm:$0xff]  }
  0x34   :  { %v1189_v37 = vld [vmem:[#allocation3 + $0xf0] sm:$0xff]   ;;  %v1190_v39 = vld [vmem:[#allocation3 + $0xf8] sm:$0xff]  }
  0x35   :  { %1053 = vmatpush3.bf16.msra.mxu0 %v1154_v3  ;;  %1137 = vmatpush3.bf16.msra.mxu1 %v1154_v3 }
  0x36   :  { %1054 = vmatprep.subr.bf16.mxu0 %v1155_v5  ;;  %1130 = vmatprep.subr.bf16.mxu1 %v1155_v5 }
  0x39   :  { %1055 = vmatpush3.bf16.msra.mxu0 %v1155_v5  ;;  %1138 = vmatpush3.bf16.msra.mxu1 %v1155_v5 }
  0x3a   :  { %1056 = vmatprep.subr.bf16.mxu0 %v1156_v6  ;;  %1131 = vmatprep.subr.bf16.mxu1 %v1156_v6 }
  0x3d   :  { %1057 = vmatpush3.bf16.msra.mxu0 %v1156_v6  ;;  %1139 = vmatpush3.bf16.msra.mxu1 %v1156_v6 }
  0x3e   :  { %1058 = vmatprep.subr.bf16.mxu0 %v1157_v7  ;;  %1132 = vmatprep.subr.bf16.mxu1 %v1157_v7 }
  0x41   :  { %1059 = vmatpush3.bf16.msra.mxu0 %v1157_v7  ;;  %1140 = vmatpush3.bf16.msra.mxu1 %v1157_v7 }
  0x42   :  { %1060 = vmatprep.subr.bf16.mxu0 %v1158_v8  ;;  %1133 = vmatprep.subr.bf16.mxu1 %v1158_v8 }
  0x45   :  { %1061 = vmatpush3.bf16.msra.mxu0 %v1158_v8  ;;  %1141 = vmatpush3.bf16.msra.mxu1 %v1158_v8 }
  0x48   :  { %1063 = vmatmul.mubr.bf16.vlgmr.msra.gmra.mrb[0].mxu0 %v1160_v10  ;;  %1095 = vmatmul.mubr.bf16.vlgmr.msra.gmra.mrb[0].mxu1 %v1176_v12 }
  0x49   :  { %1066 = vmatprep.mubr.bf16.mxu0 %v1161_v11  ;;  %1098 = vmatprep.mubr.bf16.mxu1 %v1177_v13 }
  0x50   :  { %1067 = vmatmul.mubr.bf16.gmra.mrb[4].mxu0 %v1162_v14  ;;  %1099 = vmatmul.mubr.bf16.gmra.mrb[4].mxu1 %v1178_v16 }
  0x51   :  { %1070 = vmatprep.mubr.bf16.mxu0 %v1163_v15  ;;  %1102 = vmatprep.mubr.bf16.mxu1 %v1179_v17 }
  0x58   :  { %1071 = vmatmul.mubr.bf16.gmra.mrb[8].mxu0 %v1164_v18  ;;  %1103 = vmatmul.mubr.bf16.gmra.mrb[8].mxu1 %v1180_v19 }
  0x59   :  { %1074 = vmatprep.mubr.bf16.mxu0 %v1165_v20  ;;  %1106 = vmatprep.mubr.bf16.mxu1 %v1181_v21 }
  0x60   :  { %1075 = vmatmul.mubr.bf16.gmra.mrb[12].mxu0 %v1166_v22  ;;  %1107 = vmatmul.mubr.bf16.gmra.mrb[12].mxu1 %v1182_v23 }
  0x61   :  { %1078 = vmatprep.mubr.bf16.mxu0 %v1167_v24  ;;  %1110 = vmatprep.mubr.bf16.mxu1 %v1183_v25 }
  0x68   :  { %1079 = vmatmul.mubr.bf16.gmra.mrb[16].mxu0 %v1168_v26  ;;  %1111 = vmatmul.mubr.bf16.gmra.mrb[16].mxu1 %v1184_v27 }
  0x69   :  { %1082 = vmatprep.mubr.bf16.mxu0 %v1169_v28  ;;  %1114 = vmatprep.mubr.bf16.mxu1 %v1185_v29 }
  0x70   :  { %1083 = vmatmul.mubr.bf16.gmra.mrb[20].mxu0 %v1170_v30  ;;  %1115 = vmatmul.mubr.bf16.gmra.mrb[20].mxu1 %v1186_v31 }
  0x71   :  { %1086 = vmatprep.mubr.bf16.mxu0 %v1171_v32  ;;  %1118 = vmatprep.mubr.bf16.mxu1 %v1187_v33 }
  0x78   :  { %1087 = vmatmul.mubr.bf16.gmra.mrb[24].mxu0 %v1172_v34  ;;  %1119 = vmatmul.mubr.bf16.gmra.mrb[24].mxu1 %v1188_v35 }
  0x79   :  { %1090 = vmatprep.mubr.bf16.mxu0 %v1173_v36  ;;  %1122 = vmatprep.mubr.bf16.mxu1 %v1189_v37 }
  0x80   :  { %1091 = vmatmul.mubr.bf16.gmra.mrb[28].mxu0 %v1174_v38  ;;  %1123 = vmatmul.mubr.bf16.gmra.mrb[28].mxu1 %v1190_v39 }
 0x11b   :  { %v1064_v41 = vpop.f32.mrb[0].mxu0  ;;  %v1340_v42 = vpop.f32.mrb[0].mxu1 }
 0x11c   :  { %660 = vst [vmem:[#allocation8 + $0x10] sm:$0xff] %v1064_v41  ;;  %v403_v43 = vpop.f32.mrb[1].mxu0  ;;  %692 = vst [vmem:[#allocation8 + $0x110] sm:$0xff] %v1340_v42  ;;  %v1343_v44 = vpop.f32.mrb[1].mxu1  ;;  %v794_v52 = vmul.f32 %v1064_v41, %v1064_v41 }
 0x11d   :  { %658 = vst [vmem:[#allocation8] sm:$0xff] %v403_v43  ;;  %v1065_v45 = vpop.f32.mrb[2].mxu0  ;;  %690 = vst [vmem:[#allocation8 + $0x100] sm:$0xff] %v1343_v44  ;;  %v1346_v46 = vpop.f32.mrb[2].mxu1  ;;  %v792_v49 = vmul.f32 %v403_v43, %v403_v43 }
 0x11e   :  { %661 = vst [vmem:[#allocation8 + $0x18] sm:$0xff] %v1065_v45  ;;  %v406_v47 = vpop.f32.mrb[3].mxu0  ;;  %693 = vst [vmem:[#allocation8 + $0x118] sm:$0xff] %v1346_v46  ;;  %v1349_v48 = vpop.f32.mrb[3].mxu1  ;;  %v795_v55 = vmul.f32 %v1065_v45, %v1065_v45 }
 0x11f   :  { %659 = vst [vmem:[#allocation8 + $0x8] sm:$0xff] %v406_v47  ;;  %v723_v50 = vadd.f32 %v406_v47, %v403_v43  ;;  %v793_v51 = vmul.f32 %v406_v47, %v406_v47  ;;  %691 = vst [vmem:[#allocation8 + $0x108] sm:$0xff] %v1349_v48 }
 0x121   :  { %v724_v53 = vadd.f32 %v1064_v41, %v723_v50  ;;  %v856_v54 = vadd.f32 %v793_v51, %v792_v49 }
 0x123   :  { %v857_v56 = vadd.f32 %v856_v54, %v794_v52  ;;  %v1068_v57 = vpop.f32.mrb[4].mxu0  ;;  %v725_v58 = vadd.f32 %v1065_v45, %v724_v53  ;;  %v1352_v59 = vpop.f32.mrb[4].mxu1 }
 0x124   :  { %664 = vst [vmem:[#allocation8 + $0x30] sm:$0xff] %v1068_v57  ;;  %v419_v60 = vpop.f32.mrb[5].mxu0  ;;  %696 = vst [vmem:[#allocation8 + $0x130] sm:$0xff] %v1352_v59  ;;  %v1355_v61 = vpop.f32.mrb[5].mxu1  ;;  %v798_v8 = vmul.f32 %v1068_v57, %v1068_v57 }
 0x125   :  { %662 = vst [vmem:[#allocation8 + $0x20] sm:$0xff] %v419_v60  ;;  %v726_v62 = vadd.f32 %v725_v58, %v419_v60  ;;  %v796_v63 = vmul.f32 %v419_v60, %v419_v60  ;;  %v858_v0 = vadd.f32 %v857_v56, %v795_v55  ;;  %v1069_v1 = vpop.f32.mrb[6].mxu0  ;;  %694 = vst [vmem:[#allocation8 + $0x120] sm:$0xff] %v1355_v61  ;;  %v1358_v2 = vpop.f32.mrb[6].mxu1 }
 0x126   :  { %665 = vst [vmem:[#allocation8 + $0x38] sm:$0xff] %v1069_v1  ;;  %v422_v3 = vpop.f32.mrb[7].mxu0  ;;  %697 = vst [vmem:[#allocation8 + $0x138] sm:$0xff] %v1358_v2  ;;  %v1361_v4 = vpop.f32.mrb[7].mxu1  ;;  %v799_v11 = vmul.f32 %v1069_v1, %v1069_v1 }
 0x127   :  { %v859_v5 = vadd.f32 %v858_v0, %v796_v63  ;;  %663 = vst [vmem:[#allocation8 + $0x28] sm:$0xff] %v422_v3  ;;  %v727_v6 = vadd.f32 %v726_v62, %v422_v3  ;;  %v797_v7 = vmul.f32 %v422_v3, %v422_v3  ;;  %695 = vst [vmem:[#allocation8 + $0x128] sm:$0xff] %v1361_v4 }
 0x129   :  { %v728_v9 = vadd.f32 %v1068_v57, %v727_v6  ;;  %v860_v10 = vadd.f32 %v859_v5, %v797_v7 }
 0x12b   :  { %v861_v12 = vadd.f32 %v860_v10, %v798_v8  ;;  %v1072_v13 = vpop.f32.mrb[8].mxu0  ;;  %v729_v14 = vadd.f32 %v1069_v1, %v728_v9  ;;  %v1364_v15 = vpop.f32.mrb[8].mxu1 }
 0x12c   :  { %668 = vst [vmem:[#allocation8 + $0x50] sm:$0xff] %v1072_v13  ;;  %v435_v16 = vpop.f32.mrb[9].mxu0  ;;  %700 = vst [vmem:[#allocation8 + $0x150] sm:$0xff] %v1364_v15  ;;  %v1367_v17 = vpop.f32.mrb[9].mxu1  ;;  %v802_v28 = vmul.f32 %v1072_v13, %v1072_v13 }
 0x12d   :  { %666 = vst [vmem:[#allocation8 + $0x40] sm:$0xff] %v435_v16  ;;  %v730_v18 = vadd.f32 %v729_v14, %v435_v16  ;;  %v800_v19 = vmul.f32 %v435_v16, %v435_v16  ;;  %v862_v20 = vadd.f32 %v861_v12, %v799_v11  ;;  %v1073_v21 = vpop.f32.mrb[10].mxu0  ;;  %698 = vst [vmem:[#allocation8 + $0x140] sm:$0xff] %v1367_v17  ;;  %v1370_v22 = vpop.f32.mrb[10].mxu1 }
 0x12e   :  { %669 = vst [vmem:[#allocation8 + $0x58] sm:$0xff] %v1073_v21  ;;  %v438_v23 = vpop.f32.mrb[11].mxu0  ;;  %701 = vst [vmem:[#allocation8 + $0x158] sm:$0xff] %v1370_v22  ;;  %v1373_v24 = vpop.f32.mrb[11].mxu1  ;;  %v803_v31 = vmul.f32 %v1073_v21, %v1073_v21 }
 0x12f   :  { %v863_v25 = vadd.f32 %v862_v20, %v800_v19  ;;  %667 = vst [vmem:[#allocation8 + $0x48] sm:$0xff] %v438_v23  ;;  %v731_v26 = vadd.f32 %v730_v18, %v438_v23  ;;  %v801_v27 = vmul.f32 %v438_v23, %v438_v23  ;;  %699 = vst [vmem:[#allocation8 + $0x148] sm:$0xff] %v1373_v24 }
 0x131   :  { %v732_v29 = vadd.f32 %v1072_v13, %v731_v26  ;;  %v864_v30 = vadd.f32 %v863_v25, %v801_v27 }
 0x133   :  { %v865_v32 = vadd.f32 %v864_v30, %v802_v28  ;;  %v1076_v33 = vpop.f32.mrb[12].mxu0  ;;  %v733_v34 = vadd.f32 %v1073_v21, %v732_v29  ;;  %v1376_v35 = vpop.f32.mrb[12].mxu1 }
 0x134   :  { %672 = vst [vmem:[#allocation8 + $0x70] sm:$0xff] %v1076_v33  ;;  %v451_v36 = vpop.f32.mrb[13].mxu0  ;;  %704 = vst [vmem:[#allocation8 + $0x170] sm:$0xff] %v1376_v35  ;;  %v1379_v37 = vpop.f32.mrb[13].mxu1  ;;  %v806_v52 = vmul.f32 %v1076_v33, %v1076_v33 }
 0x135   :  { %670 = vst [vmem:[#allocation8 + $0x60] sm:$0xff] %v451_v36  ;;  %v734_v38 = vadd.f32 %v733_v34, %v451_v36  ;;  %v804_v39 = vmul.f32 %v451_v36, %v451_v36  ;;  %v866_v40 = vadd.f32 %v865_v32, %v803_v31  ;;  %v1077_v41 = vpop.f32.mrb[14].mxu0  ;;  %702 = vst [vmem:[#allocation8 + $0x160] sm:$0xff] %v1379_v37  ;;  %v1382_v43 = vpop.f32.mrb[14].mxu1 }
 0x136   :  { %673 = vst [vmem:[#allocation8 + $0x78] sm:$0xff] %v1077_v41  ;;  %v454_v45 = vpop.f32.mrb[15].mxu0  ;;  %705 = vst [vmem:[#allocation8 + $0x178] sm:$0xff] %v1382_v43  ;;  %v1385_v47 = vpop.f32.mrb[15].mxu1  ;;  %v807_v55 = vmul.f32 %v1077_v41, %v1077_v41 }
 0x137   :  { %v867_v49 = vadd.f32 %v866_v40, %v804_v39  ;;  %671 = vst [vmem:[#allocation8 + $0x68] sm:$0xff] %v454_v45  ;;  %v735_v50 = vadd.f32 %v734_v38, %v454_v45  ;;  %v805_v51 = vmul.f32 %v454_v45, %v454_v45  ;;  %703 = vst [vmem:[#allocation8 + $0x168] sm:$0xff] %v1385_v47 }
 0x139   :  { %v736_v53 = vadd.f32 %v1076_v33, %v735_v50  ;;  %v868_v54 = vadd.f32 %v867_v49, %v805_v51 }
 0x13b   :  { %v869_v56 = vadd.f32 %v868_v54, %v806_v52  ;;  %v1080_v57 = vpop.f32.mrb[16].mxu0  ;;  %v737_v58 = vadd.f32 %v1077_v41, %v736_v53  ;;  %v1388_v60 = vpop.f32.mrb[16].mxu1 }
 0x13c   :  { %676 = vst [vmem:[#allocation8 + $0x90] sm:$0xff] %v1080_v57  ;;  %v467_v62 = vpop.f32.mrb[17].mxu0  ;;  %708 = vst [vmem:[#allocation8 + $0x190] sm:$0xff] %v1388_v60  ;;  %v1391_v63 = vpop.f32.mrb[17].mxu1  ;;  %v810_v12 = vmul.f32 %v1080_v57, %v1080_v57 }
 0x13d   :  { %674 = vst [vmem:[#allocation8 + $0x80] sm:$0xff] %v467_v62  ;;  %v738_v0 = vadd.f32 %v737_v58, %v467_v62  ;;  %v808_v1 = vmul.f32 %v467_v62, %v467_v62  ;;  %v870_v3 = vadd.f32 %v869_v56, %v807_v55  ;;  %v1081_v5 = vpop.f32.mrb[18].mxu0  ;;  %706 = vst [vmem:[#allocation8 + $0x180] sm:$0xff] %v1391_v63  ;;  %v1394_v6 = vpop.f32.mrb[18].mxu1 }
 0x13e   :  { %677 = vst [vmem:[#allocation8 + $0x98] sm:$0xff] %v1081_v5  ;;  %v470_v7 = vpop.f32.mrb[19].mxu0  ;;  %709 = vst [vmem:[#allocation8 + $0x198] sm:$0xff] %v1394_v6  ;;  %v1397_v8 = vpop.f32.mrb[19].mxu1  ;;  %v811_v16 = vmul.f32 %v1081_v5, %v1081_v5 }
 0x13f   :  { %v871_v9 = vadd.f32 %v870_v3, %v808_v1  ;;  %675 = vst [vmem:[#allocation8 + $0x88] sm:$0xff] %v470_v7  ;;  %v739_v10 = vadd.f32 %v738_v0, %v470_v7  ;;  %v809_v11 = vmul.f32 %v470_v7, %v470_v7  ;;  %707 = vst [vmem:[#allocation8 + $0x188] sm:$0xff] %v1397_v8 }
 0x141   :  { %v740_v13 = vadd.f32 %v1080_v57, %v739_v10  ;;  %v872_v14 = vadd.f32 %v871_v9, %v809_v11 }
 0x143   :  { %v873_v18 = vadd.f32 %v872_v14, %v810_v12  ;;  %v1084_v19 = vpop.f32.mrb[20].mxu0  ;;  %v741_v20 = vadd.f32 %v1081_v5, %v740_v13  ;;  %v1400_v21 = vpop.f32.mrb[20].mxu1 }
 0x144   :  { %680 = vst [vmem:[#allocation8 + $0xb0] sm:$0xff] %v1084_v19  ;;  %v483_v23 = vpop.f32.mrb[21].mxu0  ;;  %712 = vst [vmem:[#allocation8 + $0x1b0] sm:$0xff] %v1400_v21  ;;  %v1403_v25 = vpop.f32.mrb[21].mxu1  ;;  %v814_v38 = vmul.f32 %v1084_v19, %v1084_v19 }
 0x145   :  { %678 = vst [vmem:[#allocation8 + $0xa0] sm:$0xff] %v483_v23  ;;  %v742_v26 = vadd.f32 %v741_v20, %v483_v23  ;;  %v812_v27 = vmul.f32 %v483_v23, %v483_v23  ;;  %v874_v28 = vadd.f32 %v873_v18, %v811_v16  ;;  %v1085_v29 = vpop.f32.mrb[22].mxu0  ;;  %710 = vst [vmem:[#allocation8 + $0x1a0] sm:$0xff] %v1403_v25  ;;  %v1406_v30 = vpop.f32.mrb[22].mxu1 }
 0x146   :  { %681 = vst [vmem:[#allocation8 + $0xb8] sm:$0xff] %v1085_v29  ;;  %v486_v31 = vpop.f32.mrb[23].mxu0  ;;  %713 = vst [vmem:[#allocation8 + $0x1b8] sm:$0xff] %v1406_v30  ;;  %v1409_v32 = vpop.f32.mrb[23].mxu1  ;;  %v815_v41 = vmul.f32 %v1085_v29, %v1085_v29 }
 0x147   :  { %v875_v33 = vadd.f32 %v874_v28, %v812_v27  ;;  %679 = vst [vmem:[#allocation8 + $0xa8] sm:$0xff] %v486_v31  ;;  %v743_v34 = vadd.f32 %v742_v26, %v486_v31  ;;  %v813_v36 = vmul.f32 %v486_v31, %v486_v31  ;;  %711 = vst [vmem:[#allocation8 + $0x1a8] sm:$0xff] %v1409_v32 }
 0x149   :  { %v744_v39 = vadd.f32 %v1084_v19, %v743_v34  ;;  %v876_v40 = vadd.f32 %v875_v33, %v813_v36 }
 0x14b   :  { %v877_v45 = vadd.f32 %v876_v40, %v814_v38  ;;  %v1088_v49 = vpop.f32.mrb[24].mxu0  ;;  %v745_v50 = vadd.f32 %v1085_v29, %v744_v39  ;;  %v1412_v51 = vpop.f32.mrb[24].mxu1 }
 0x14c   :  { %684 = vst [vmem:[#allocation8 + $0xd0] sm:$0xff] %v1088_v49  ;;  %v499_v52 = vpop.f32.mrb[25].mxu0  ;;  %716 = vst [vmem:[#allocation8 + $0x1d0] sm:$0xff] %v1412_v51  ;;  %v1415_v53 = vpop.f32.mrb[25].mxu1  ;;  %v818_v7 = vmul.f32 %v1088_v49, %v1088_v49 }
 0x14d   :  { %682 = vst [vmem:[#allocation8 + $0xc0] sm:$0xff] %v499_v52  ;;  %v746_v54 = vadd.f32 %v745_v50, %v499_v52  ;;  %v816_v55 = vmul.f32 %v499_v52, %v499_v52  ;;  %v878_v56 = vadd.f32 %v877_v45, %v815_v41  ;;  %v1089_v57 = vpop.f32.mrb[26].mxu0  ;;  %714 = vst [vmem:[#allocation8 + $0x1c0] sm:$0xff] %v1415_v53  ;;  %v1418_v58 = vpop.f32.mrb[26].mxu1 }
 0x14e   :  { %685 = vst [vmem:[#allocation8 + $0xd8] sm:$0xff] %v1089_v57  ;;  %v502_v62 = vpop.f32.mrb[27].mxu0  ;;  %717 = vst [vmem:[#allocation8 + $0x1d8] sm:$0xff] %v1418_v58  ;;  %v1421_v0 = vpop.f32.mrb[27].mxu1  ;;  %v819_v11 = vmul.f32 %v1089_v57, %v1089_v57 }
 0x14f   :  { %v879_v1 = vadd.f32 %v878_v56, %v816_v55  ;;  %683 = vst [vmem:[#allocation8 + $0xc8] sm:$0xff] %v502_v62  ;;  %v747_v3 = vadd.f32 %v746_v54, %v502_v62  ;;  %v817_v5 = vmul.f32 %v502_v62, %v502_v62  ;;  %715 = vst [vmem:[#allocation8 + $0x1c8] sm:$0xff] %v1421_v0 }
 0x151   :  { %v748_v9 = vadd.f32 %v1088_v49, %v747_v3  ;;  %v880_v10 = vadd.f32 %v879_v1, %v817_v5 }
 0x153   :  { %v881_v12 = vadd.f32 %v880_v10, %v818_v7  ;;  %v1092_v13 = vpop.f32.mrb[28].mxu0  ;;  %v749_v14 = vadd.f32 %v1089_v57, %v748_v9  ;;  %v1424_v16 = vpop.f32.mrb[28].mxu1 }
 0x154   :  { %688 = vst [vmem:[#allocation8 + $0xf0] sm:$0xff] %v1092_v13  ;;  %v515_v18 = vpop.f32.mrb[29].mxu0  ;;  %720 = vst [vmem:[#allocation8 + $0x1f0] sm:$0xff] %v1424_v16  ;;  %v1427_v19 = vpop.f32.mrb[29].mxu1 }
 0x155   :  { %686 = vst [vmem:[#allocation8 + $0xe0] sm:$0xff] %v515_v18  ;;  %v750_v20 = vadd.f32 %v749_v14, %v515_v18  ;;  %v820_v23 = vmul.f32 %v515_v18, %v515_v18  ;;  %v882_v26 = vadd.f32 %v881_v12, %v819_v11  ;;  %v1093_v27 = vpop.f32.mrb[30].mxu0  ;;  %718 = vst [vmem:[#allocation8 + $0x1e0] sm:$0xff] %v1427_v19  ;;  %v1430_v28 = vpop.f32.mrb[30].mxu1 }
 0x156   :  { %689 = vst [vmem:[#allocation8 + $0xf8] sm:$0xff] %v1093_v27  ;;  %v518_v29 = vpop.f32.mrb[31].mxu0  ;;  %721 = vst [vmem:[#allocation8 + $0x1f8] sm:$0xff] %v1430_v28  ;;  %v1433_v31 = vpop.f32.mrb[31].mxu1 }
 0x157   :  { %v883_v33 = vadd.f32 %v882_v26, %v820_v23  ;;  %687 = vst [vmem:[#allocation8 + $0xe8] sm:$0xff] %v518_v29  ;;  %v751_v34 = vadd.f32 %v750_v20, %v518_v29  ;;  %v821_v36 = vmul.f32 %v518_v29, %v518_v29  ;;  %719 = vst [vmem:[#allocation8 + $0x1e8] sm:$0xff] %v1433_v31 }
 0x158   :  { %1246 = shalt.err (!%p1243_p6)
}
 0x159   :  { %s1247_s14 = scalar_lea.hbm %s1558_s2, 8192 }
 0x15a   :  { %p1248_p7 = scmp.ne.s32.totalorder %s1558_s2, %s1247_s14  ;;  %p1251_p8 = scmp.lt.u32.totalorder %s1247_s14, %s1558_s2 }
 0x15c   :  { %p1253_p9 = pnand %p1251_p8, %p1248_p7 }
 0x15e   :  { %1256 = shalt.err (!%p1253_p9)
}
 0x15f   :  { %s1293_s19 = smov 128   ;;  %s1294_s20 = smov 8   ;;  %v822_v38 = vmul.f32 %v1092_v13, %v1092_v13  ;;  %v752_v39 = vadd.f32 %v1092_v13, %v751_v34  ;;  %v884_v40 = vadd.f32 %v883_v33, %v821_v36  ;;  %v823_v41 = vmul.f32 %v1093_v27, %v1093_v27 }
 0x160   :  { %945 = dma.vmem_to_hbm [thread:$0]  %s940_s10, 8192, %s1558_s2, [#allocation5], %s1293_s19, %s1293_s19, %s1294_s20   ;;  %v824_v50 = vmul.f32 %v1343_v44, %v1343_v44  ;;  %v825_v57 = vmul.f32 %v1349_v48, %v1349_v48  ;;  %v826_v62 = vmul.f32 %v1340_v42, %v1340_v42  ;;  %v827_v5 = vmul.f32 %v1346_v46, %v1346_v46 }
 0x161   :  { %v885_v45 = vadd.f32 %v884_v40, %v822_v38  ;;  %v753_v49 = vadd.f32 %v1093_v27, %v752_v39  ;;  %v829_v13 = vmul.f32 %v1361_v4, %v1361_v4  ;;  %v833_v33 = vmul.f32 %v1373_v24, %v1373_v24  ;;  %s1295_s2 = smov [#allocation9]  }
 0x162   :  { %vm925_vm0 = vcmask 1040384   ;;  %s952_s23 = sshll.u32 %s1295_s2, 4  ;;  %s953_s23 = int_to_ptr.vmem [resolvable:$true] %s952_s23 }
 0x163   :  { %v754_v52 = vadd.f32 %v753_v49, %v1343_v44  ;;  %v886_v54 = vadd.f32 %v885_v45, %v823_v41  ;;  %v828_v44 = vmul.f32 %v1355_v61, %v1355_v61  ;;  %v837_v49 = vmul.f32 %v1385_v47, %v1385_v47  ;;  %s1257_s24 = scalar_lea.vmem %s953_s23, 32  ;;  %p1262_p11 = scmp.lt.s32.totalorder %s953_s23, %s953_s23 }
 0x164   :  { %p1258_p10 = scmp.ne.s32.totalorder %s953_s23, %s1257_s24  ;;  %p1263_p12 = scmp.lt.s32.totalorder %s1257_s24, %s1257_s24 }
 0x165   :  { %v887_v55 = vadd.f32 %v886_v54, %v824_v50  ;;  %v755_v56 = vadd.f32 %v754_v52, %v1349_v48 }
 0x166   :  { %p1264_p13 = por %p1263_p12, %p1262_p11 }
 0x167   :  { %v756_v1 = vadd.f32 %v1340_v42, %v755_v56  ;;  %v888_v3 = vadd.f32 %v887_v55, %v825_v57  ;;  %v830_v42 = vmul.f32 %v1352_v59, %v1352_v59 }
 0x168   :  { %p1265_p0 = pnand %p1264_p13, %p1258_p10 }
 0x169   :  { %v889_v7 = vadd.f32 %v888_v3, %v826_v62  ;;  %v757_v9 = vadd.f32 %v1346_v46, %v756_v1  ;;  %v831_v46 = vmul.f32 %v1358_v2, %v1358_v2  ;;  %v841_v1 = vmul.f32 %v1397_v8, %v1397_v8 }
 0x16b   :  { %v758_v10 = vadd.f32 %v757_v9, %v1355_v61  ;;  %v890_v11 = vadd.f32 %v889_v7, %v827_v5  ;;  %v832_v61 = vmul.f32 %v1367_v17, %v1367_v17 }
 0x16d   :  { %v891_v12 = vadd.f32 %v890_v11, %v828_v44  ;;  %v759_v48 = vadd.f32 %v758_v10, %v1361_v4 }
 0x16f   :  { %v760_v14 = vadd.f32 %v1352_v59, %v759_v48  ;;  %v892_v18 = vadd.f32 %v891_v12, %v829_v13  ;;  %v834_v59 = vmul.f32 %v1364_v15, %v1364_v15  ;;  %v845_v12 = vmul.f32 %v1409_v32, %v1409_v32 }
 0x171   :  { %v893_v20 = vadd.f32 %v892_v18, %v830_v42  ;;  %v761_v23 = vadd.f32 %v1358_v2, %v760_v14  ;;  %v835_v2 = vmul.f32 %v1370_v22, %v1370_v22 }
 0x173   :  { %v762_v26 = vadd.f32 %v761_v23, %v1367_v17  ;;  %v894_v27 = vadd.f32 %v893_v20, %v831_v46  ;;  %v836_v17 = vmul.f32 %v1379_v37, %v1379_v37  ;;  %v849_v23 = vmul.f32 %v1421_v0, %v1421_v0 }
 0x175   :  { %v895_v29 = vadd.f32 %v894_v27, %v832_v61  ;;  %v763_v4 = vadd.f32 %v762_v26, %v1373_v24 }
 0x177   :  { %v764_v34 = vadd.f32 %v1364_v15, %v763_v4  ;;  %v896_v36 = vadd.f32 %v895_v29, %v833_v33  ;;  %v838_v15 = vmul.f32 %v1376_v35, %v1376_v35 }
 0x179   :  { %v897_v38 = vadd.f32 %v896_v36, %v834_v59  ;;  %v765_v39 = vadd.f32 %v1370_v22, %v764_v34  ;;  %v839_v22 = vmul.f32 %v1382_v43, %v1382_v43  ;;  %v853_v34 = vmul.f32 %v1433_v31, %v1433_v31 }
 0x17b   :  { %v766_v40 = vadd.f32 %v765_v39, %v1379_v37  ;;  %v898_v41 = vadd.f32 %v897_v38, %v835_v2  ;;  %v840_v37 = vmul.f32 %v1391_v63, %v1391_v63 }
 0x17d   :  { %v899_v45 = vadd.f32 %v898_v41, %v836_v17  ;;  %v767_v24 = vadd.f32 %v766_v40, %v1385_v47 }
 0x17f   :  { %v768_v50 = vadd.f32 %v1376_v35, %v767_v24  ;;  %v900_v52 = vadd.f32 %v899_v45, %v837_v49  ;;  %v842_v35 = vmul.f32 %v1388_v60, %v1388_v60 }
 0x181   :  { %v901_v54 = vadd.f32 %v900_v52, %v838_v15  ;;  %v769_v55 = vadd.f32 %v1382_v43, %v768_v50  ;;  %v843_v43 = vmul.f32 %v1394_v6, %v1394_v6 }
 0x183   :  { %v770_v56 = vadd.f32 %v769_v55, %v1391_v63  ;;  %v902_v57 = vadd.f32 %v901_v54, %v839_v22  ;;  %v844_v63 = vmul.f32 %v1403_v25, %v1403_v25 }
 0x185   :  { %v903_v62 = vadd.f32 %v902_v57, %v840_v37  ;;  %v771_v47 = vadd.f32 %v770_v56, %v1397_v8 }
 0x187   :  { %v772_v3 = vadd.f32 %v1388_v60, %v771_v47  ;;  %v904_v5 = vadd.f32 %v903_v62, %v841_v1  ;;  %v846_v60 = vmul.f32 %v1400_v21, %v1400_v21 }
 0x189   :  { %v905_v7 = vadd.f32 %v904_v5, %v842_v35  ;;  %v773_v9 = vadd.f32 %v1394_v6, %v772_v3  ;;  %v847_v6 = vmul.f32 %v1406_v30, %v1406_v30 }
 0x18b   :  { %v774_v44 = vadd.f32 %v773_v9, %v1403_v25  ;;  %v906_v10 = vadd.f32 %v905_v7, %v843_v43  ;;  %v848_v25 = vmul.f32 %v1415_v53, %v1415_v53 }
 0x18d   :  { %v907_v11 = vadd.f32 %v906_v10, %v844_v63  ;;  %v775_v8 = vadd.f32 %v774_v44, %v1409_v32 }
 0x18f   :  { %v776_v48 = vadd.f32 %v1400_v21, %v775_v8  ;;  %v908_v13 = vadd.f32 %v907_v11, %v845_v12  ;;  %v850_v21 = vmul.f32 %v1412_v51, %v1412_v51 }
 0x191   :  { %v909_v42 = vadd.f32 %v908_v13, %v846_v60  ;;  %v777_v14 = vadd.f32 %v1406_v30, %v776_v48  ;;  %v851_v30 = vmul.f32 %v1418_v58, %v1418_v58 }
 0x193   :  { %v778_v18 = vadd.f32 %v777_v14, %v1415_v53  ;;  %v910_v46 = vadd.f32 %v909_v42, %v847_v6  ;;  %v852_v53 = vmul.f32 %v1427_v19, %v1427_v19 }
 0x195   :  { %v911_v20 = vadd.f32 %v910_v46, %v848_v25  ;;  %v779_v32 = vadd.f32 %v778_v18, %v1421_v0 }
 0x197   :  { %v780_v61 = vadd.f32 %v1412_v51, %v779_v32  ;;  %v912_v26 = vadd.f32 %v911_v20, %v849_v23  ;;  %v854_v51 = vmul.f32 %v1424_v16, %v1424_v16 }
 0x199   :  { %v913_v27 = vadd.f32 %v912_v26, %v850_v21  ;;  %v781_v29 = vadd.f32 %v1418_v58, %v780_v61  ;;  %v855_v58 = vmul.f32 %v1430_v28, %v1430_v28 }
 0x19b   :  { %v782_v4 = vadd.f32 %v781_v29, %v1427_v19  ;;  %v914_v33 = vadd.f32 %v913_v27, %v851_v30 }
 0x19d   :  { %v915_v59 = vadd.f32 %v914_v33, %v852_v53  ;;  %v783_v0 = vadd.f32 %v782_v4, %v1433_v31 }
 0x19f   :  { %v784_v36 = vadd.f32 %v1424_v16, %v783_v0  ;;  %v916_v2 = vadd.f32 %v915_v59, %v853_v34  ;;  %v722_v16 = vld [vmem:[#allocation2] sm:$0x3] }
 0x1a1   :  { %v785_v38 = vadd.f32 %v1430_v28, %v784_v36  ;;  %v917_v39 = vadd.f32 %v916_v2, %v854_v51 }
 0x1a3   :  { %v786_v19 = vrot.slane %v785_v38, 4  ;;  %v918_v17 = vadd.f32 %v917_v39, %v855_v58 }
 0x1a5   :  { %v787_v40 = vadd.f32 %v786_v19, %v785_v38  ;;  %v919_v41 = vrot.slane %v918_v17, 4 }
 0x1a7   :  { %v788_v45 = vrot.slane %v787_v40, 2  ;;  %v920_v24 = vadd.f32 %v919_v41, %v918_v17 }
 0x1a9   :  { %v789_v49 = vadd.f32 %v788_v45, %v787_v40  ;;  %v921_v31 = vrot.slane %v920_v24, 2 }
 0x1ab   :  { %v790_v15 = vrot.slane %v789_v49, 1  ;;  %v922_v50 = vadd.f32 %v921_v31, %v920_v24 }
 0x1ad   :  { %v923_v52 = vrot.slane %v922_v50, 1  ;;  %v791_v22 = vadd.f32 %v790_v15, %v789_v49 }
 0x1af   :  { %v924_v54 = vadd.f32 %v923_v52, %v922_v50 }
 0x1b1   :  { %v926_v55 = vsel %vm925_vm0, %v791_v22, %v924_v54 }
 0x1b2   :  { %v927_v37 = vadd.f32 %v926_v55, %v722_v16 }
 0x1b4   :  { %928 = vst [vmem:[#allocation2] sm:$0x3] %v927_v37 }
 0x1bb   :  { %v932_v28 = vld [vmem:[#allocation2] sm:$0x3] }
 0x1bc   :  { %933 = vst [vmem:[#allocation9] sm:$0x3] %v932_v28 }
 0x1bd   :  { %1268 = shalt.err (!%p1265_p0)
}
 0x1be   :  { %s1269_s27 = scalar_lea.hbm %s1559_s3, 32 }
 0x1bf   :  { %p1270_p1 = scmp.ne.s32.totalorder %s1559_s3, %s1269_s27  ;;  %p1273_p2 = scmp.lt.u32.totalorder %s1269_s27, %s1559_s3 }
 0x1c1   :  { %p1275_p3 = pnand %p1273_p2, %p1270_p1 }
 0x1c3   :  { %1278 = shalt.err (!%p1275_p3)
}
 0x1c4   :  { %955 = dma.vmem_to_hbm [thread:$0]  %s953_s23, 32, %s1559_s3, [#allocation10]  }
 0x1c5   :  { %1283 = dma.done.wait [#allocation5], 8192  }
 0x1c6   :  { %1284 = vsyncadd [#allocation5], 4294959104 }
 0x1c7   :  { %1285 = dma.done.wait [#allocation10], 32  }
 0x1c8   :  { %1286 = vsyncadd [#allocation10], 4294967264 }
 0x1c9   :  { %962 = vsyncpa [#allocation4], 1 }
 0x1ca   :  { %963 = vsyncpa [#allocation7], 1 }
 0x1cb   :  { %964 = vsyncpa [#allocation5], 1 }
 0x1cc   :  { %965 = vsyncpa [#allocation10], 1 }

</bundles_post_ra>
